<compile_context>
chip_gen: v6e
topology: v6e:2x2x1
jax: 0.10.0
libtpu: 0.0.40
codegen_flags: <defaults>
</compile_context>

<pallas_src>
import functools
import math

import numpy as np
import jax
import jax.numpy as jnp
from jax.experimental import pallas as pl
from jax.experimental.pallas import tpu as pltpu


# ----------------------------------------------------------------------------
# Parameter setup (plain NumPy glue, done once at trace time).
# ----------------------------------------------------------------------------
def make_pos_emb(in_t_dim: int, in_f_dim: int) -> jnp.ndarray:
    """Sinusoidal positional embedding, exactly as PositionalEncoding builds it.
    Returns shape (1, T, F)."""
    assert in_f_dim % 2 == 0, "PositionalEncoding (like the PyTorch ref) needs even d_model"
    position = np.arange(in_t_dim, dtype=np.float32)[:, None]                 # (T, 1)
    div_term = np.exp(
        np.arange(0, in_f_dim, 2, dtype=np.float32) * (-math.log(10000.0) / in_f_dim)
    )                                                                         # (F/2,)
    pe = np.zeros((in_t_dim, in_f_dim), dtype=np.float32)
    pe[:, 0::2] = np.sin(position * div_term)
    pe[:, 1::2] = np.cos(position * div_term)
    return jnp.asarray(pe[None, :, :])                                        # (1, T, F)


# ----------------------------------------------------------------------------
# Pallas kernel: fused pos-emb add + adaptive avg/max pooling over time.
# One batch TILE (Bt rows) per grid step.  Pure VPU: per-row add, running
# sum, running max; one lane-dense store per output row.
# ----------------------------------------------------------------------------
def _base_kernel(x_ref, pe_ref, o_ref, *, in_len: int, out_len: int):
    # x_ref:  (Bt, T, F)  input tile
    # pe_ref: (1,  T, F)  positional embedding (broadcast over batch)
    # o_ref:  (Bt, O, F)  pooled output tile
    for i in range(out_len):
        s = (i * in_len) // out_len                 # floor(i*T/O)
        e = -(-((i + 1) * in_len) // out_len)       # ceil((i+1)*T/O)
        inv_k = 1.0 / float(e - s)

        row = x_ref[:, s, :] + pe_ref[:, s, :]      # (Bt, F) + (1, F) -> (Bt, F)
        acc = row                                   # running sum  (avg pool)
        mx = row                                    # running max  (max pool)
        for j in range(s + 1, e):
            row = x_ref[:, j, :] + pe_ref[:, j, :]
            acc = acc + row
            mx = jnp.maximum(mx, row)

        # Combined (avg + max) / 2, written straight to the output row
        # (no VMEM scratch round trip; lane-dense when F is a multiple of 128).
        o_ref[:, i, :] = ((acc * inv_k + mx) * 0.5).astype(o_ref.dtype)


def _pick_batch_tile(batch: int, bytes_per_batch_row: int,
                     target_bytes: int, min_steps: int = 2) -> int:
    """Largest batch tile whose input block stays under `target_bytes`,
    capped so the grid has >= `min_steps` steps (v7x megacore + pipelining)."""
    max_bt = max(1, target_bytes // max(1, bytes_per_batch_row))
    bt = min(batch, max_bt)
    if batch >= min_steps:
        bt = min(bt, -(-batch // min_steps))        # ceil(batch / min_steps)
    return max(1, bt)


def base_forward(x: jnp.ndarray, pos_emb: jnp.ndarray, out_len: int, *,
                 target_block_bytes: int = 4 * 1024 * 1024) -> jnp.ndarray:
    """x: (B, T, F) float32, pos_emb: (1, T, F). Returns (B, out_len, F)."""
    B, T, F = x.shape
    assert pos_emb.shape == (1, T, F)

    # Batch-block the grid: ~target_block_bytes per input block.  Blocks are
    # double-buffered by Pallas; 2x(input) + 2x(output) at 4 MiB input blocks
    # stays well inside v7x's 64 MiB VMEM.  No divisor requirement: the grid
    # uses cdiv and any padded batch rows only feed discarded output rows.
    bt = _pick_batch_tile(B, T * F * x.dtype.itemsize, target_block_bytes)
    grid = (pl.cdiv(B, bt),)

    kernel = functools.partial(_base_kernel, in_len=T, out_len=out_len)
    return pl.pallas_call(
        kernel,
        out_shape=jax.ShapeDtypeStruct((B, out_len, F), x.dtype),
        grid=grid,
        in_specs=[
            pl.BlockSpec((bt, T, F), lambda b: (b, 0, 0)),        # streamed batch tile
            pl.BlockSpec((1, T, F), lambda b: (0, 0, 0)),         # shared pos_emb
        ],
        out_specs=pl.BlockSpec((bt, out_len, F), lambda b: (b, 0, 0)),
        compiler_params=pltpu.CompilerParams(
            dimension_semantics=("parallel",),       # shard batch tiles across TCs
            vmem_limit_bytes=32 * 1024 * 1024,       # > v5e's 16 MiB scoped default
        ),
    )(x, pos_emb)


# ----------------------------------------------------------------------------
# Pure-JAX reference (mirrors the PyTorch semantics) for a correctness check.
# ----------------------------------------------------------------------------
def _reference(x, pos_emb, out_len):
    xp = x + pos_emb
    _, T, _ = xp.shape
    rows = []
    for i in range(out_len):
        s = (i * T) // out_len
        e = -(-((i + 1) * T) // out_len)
        win = xp[:, s:e, :]
        rows.append((jnp.mean(win, axis=1) + jnp.max(win, axis=1)) * 0.5)
    return jnp.stack(rows, axis=1)


# TODO(synk): Base.forward()/frame_warping() raise NotImplementedError in the
# reference; data-dependent control-flow helpers (update_weight's per-element
# while loop, score_norm's per-batch branching, guide_loss's boolean-mask
# indexing) are inherently scalar/dynamic and are not ported to the kernel.

if __name__ == "__main__":
    # Module config: in_t_dim=16, in_f_dim=128 (the realistic pydiffres
    # mel-bin count -> lane-dense), dimension_reduction_rate=0.25
    # -> output_seq_length = int(16 * 0.75) = 12 (non-divisible case exercises
    #    true adaptive-pool window semantics, including overlapping windows).
    B, T, F = 2, 16, 128
    reduction_rate = 0.25
    out_len = int(T * (1.0 - reduction_rate))

    key = jax.random.PRNGKey(0)
    x = jax.random.normal(key, (B, T, F), dtype=jnp.float32)
    pos_emb = make_pos_emb(T, F)

    y = base_forward(x, pos_emb, out_len)
    y = jax.block_until_ready(y)

    y_ref = _reference(x, pos_emb, out_len)
    assert y.shape == (B, out_len, F)
    assert jnp.allclose(y, y_ref, atol=1e-5, rtol=1e-5), "mismatch vs reference"

    print("KERNEL_OK")
</pallas_src>

<mosaic_0001>
module attributes {stable_mosaic.version = 11 : i64} {
  func.func @_base_kernel(%arg0: i32, %arg1: memref<1x16x128xf32, #tpu.memory_space<vmem>>, %arg2: memref<1x16x128xf32, #tpu.memory_space<vmem>>, %arg3: memref<1x12x128xf32, #tpu.memory_space<vmem>>) attributes {dimension_semantics = [#tpu.dimension_semantics<parallel>], iteration_bounds = array<i64: 2>, scalar_prefetch = 0 : i64, scratch_operands = 0 : i64, tpu.core_type = #tpu.core_type<tc>, window_params = [{transform_indices = @transform_0, window_bounds = array<i64: 1, 16, 128>}, {pipeline_mode = #tpu.pipeline_mode<synchronous>, transform_indices = @transform_1, window_bounds = array<i64: 1, 16, 128>}, {transform_indices = @transform_2, window_bounds = array<i64: 1, 12, 128>}]} {
    %c0 = arith.constant 0 : index
    %c0_0 = arith.constant 0 : index
    %c0_1 = arith.constant 0 : index
    %0 = vector.load %arg1[%c0, %c0_0, %c0_1] : memref<1x16x128xf32, #tpu.memory_space<vmem>>, vector<1x1x128xf32>
    %1 = vector.shape_cast %0 : vector<1x1x128xf32> to vector<1x128xf32>
    %c0_2 = arith.constant 0 : index
    %c0_3 = arith.constant 0 : index
    %c0_4 = arith.constant 0 : index
    %2 = vector.load %arg2[%c0_2, %c0_3, %c0_4] : memref<1x16x128xf32, #tpu.memory_space<vmem>>, vector<1x1x128xf32>
    %3 = vector.shape_cast %2 : vector<1x1x128xf32> to vector<1x128xf32>
    %4 = arith.addf %1, %3 : vector<1x128xf32>
    %c0_5 = arith.constant 0 : index
    %c1 = arith.constant 1 : index
    %c0_6 = arith.constant 0 : index
    %5 = vector.load %arg1[%c0_5, %c1, %c0_6] : memref<1x16x128xf32, #tpu.memory_space<vmem>>, vector<1x1x128xf32>
    %6 = vector.shape_cast %5 : vector<1x1x128xf32> to vector<1x128xf32>
    %c0_7 = arith.constant 0 : index
    %c1_8 = arith.constant 1 : index
    %c0_9 = arith.constant 0 : index
    %7 = vector.load %arg2[%c0_7, %c1_8, %c0_9] : memref<1x16x128xf32, #tpu.memory_space<vmem>>, vector<1x1x128xf32>
    %8 = vector.shape_cast %7 : vector<1x1x128xf32> to vector<1x128xf32>
    %9 = arith.addf %6, %8 : vector<1x128xf32>
    %10 = arith.addf %4, %9 : vector<1x128xf32>
    %11 = arith.maximumf %4, %9 : vector<1x128xf32>
    %cst = arith.constant 5.000000e-01 : f32
    %12 = vector.broadcast %cst : f32 to vector<1x128xf32>
    %13 = arith.mulf %10, %12 : vector<1x128xf32>
    %14 = arith.addf %13, %11 : vector<1x128xf32>
    %cst_10 = arith.constant 5.000000e-01 : f32
    %15 = vector.broadcast %cst_10 : f32 to vector<1x128xf32>
    %16 = arith.mulf %14, %15 : vector<1x128xf32>
    %c0_11 = arith.constant 0 : index
    %c0_12 = arith.constant 0 : index
    %c0_13 = arith.constant 0 : index
    %17 = vector.load %arg3[%c0_11, %c0_12, %c0_13] : memref<1x12x128xf32, #tpu.memory_space<vmem>>, vector<1x1x128xf32>
    %18 = vector.shape_cast %17 : vector<1x1x128xf32> to vector<1x128xf32>
    %19 = vector.shape_cast %16 : vector<1x128xf32> to vector<1x1x128xf32>
    tpu.vector_store %arg3[%c0_11, %c0_12, %c0_13], %19 {strides = array<i32>} : memref<1x12x128xf32, #tpu.memory_space<vmem>>, vector<1x1x128xf32>,
    %c0_14 = arith.constant 0 : index
    %c1_15 = arith.constant 1 : index
    %c0_16 = arith.constant 0 : index
    %20 = vector.load %arg1[%c0_14, %c1_15, %c0_16] : memref<1x16x128xf32, #tpu.memory_space<vmem>>, vector<1x1x128xf32>
    %21 = vector.shape_cast %20 : vector<1x1x128xf32> to vector<1x128xf32>
    %c0_17 = arith.constant 0 : index
    %c1_18 = arith.constant 1 : index
    %c0_19 = arith.constant 0 : index
    %22 = vector.load %arg2[%c0_17, %c1_18, %c0_19] : memref<1x16x128xf32, #tpu.memory_space<vmem>>, vector<1x1x128xf32>
    %23 = vector.shape_cast %22 : vector<1x1x128xf32> to vector<1x128xf32>
    %24 = arith.addf %21, %23 : vector<1x128xf32>
    %c0_20 = arith.constant 0 : index
    %c2 = arith.constant 2 : index
    %c0_21 = arith.constant 0 : index
    %25 = vector.load %arg1[%c0_20, %c2, %c0_21] : memref<1x16x128xf32, #tpu.memory_space<vmem>>, vector<1x1x128xf32>
    %26 = vector.shape_cast %25 : vector<1x1x128xf32> to vector<1x128xf32>
    %c0_22 = arith.constant 0 : index
    %c2_23 = arith.constant 2 : index
    %c0_24 = arith.constant 0 : index
    %27 = vector.load %arg2[%c0_22, %c2_23, %c0_24] : memref<1x16x128xf32, #tpu.memory_space<vmem>>, vector<1x1x128xf32>
    %28 = vector.shape_cast %27 : vector<1x1x128xf32> to vector<1x128xf32>
    %29 = arith.addf %26, %28 : vector<1x128xf32>
    %30 = arith.addf %24, %29 : vector<1x128xf32>
    %31 = arith.maximumf %24, %29 : vector<1x128xf32>
    %cst_25 = arith.constant 5.000000e-01 : f32
    %32 = vector.broadcast %cst_25 : f32 to vector<1x128xf32>
    %33 = arith.mulf %30, %32 : vector<1x128xf32>
    %34 = arith.addf %33, %31 : vector<1x128xf32>
    %cst_26 = arith.constant 5.000000e-01 : f32
    %35 = vector.broadcast %cst_26 : f32 to vector<1x128xf32>
    %36 = arith.mulf %34, %35 : vector<1x128xf32>
    %c0_27 = arith.constant 0 : index
    %c1_28 = arith.constant 1 : index
    %c0_29 = arith.constant 0 : index
    %37 = vector.load %arg3[%c0_27, %c1_28, %c0_29] : memref<1x12x128xf32, #tpu.memory_space<vmem>>, vector<1x1x128xf32>
    %38 = vector.shape_cast %37 : vector<1x1x128xf32> to vector<1x128xf32>
    %39 = vector.shape_cast %36 : vector<1x128xf32> to vector<1x1x128xf32>
    tpu.vector_store %arg3[%c0_27, %c1_28, %c0_29], %39 {strides = array<i32>} : memref<1x12x128xf32, #tpu.memory_space<vmem>>, vector<1x1x128xf32>,
    %c0_30 = arith.constant 0 : index
    %c2_31 = arith.constant 2 : index
    %c0_32 = arith.constant 0 : index
    %40 = vector.load %arg1[%c0_30, %c2_31, %c0_32] : memref<1x16x128xf32, #tpu.memory_space<vmem>>, vector<1x1x128xf32>
    %41 = vector.shape_cast %40 : vector<1x1x128xf32> to vector<1x128xf32>
    %c0_33 = arith.constant 0 : index
    %c2_34 = arith.constant 2 : index
    %c0_35 = arith.constant 0 : index
    %42 = vector.load %arg2[%c0_33, %c2_34, %c0_35] : memref<1x16x128xf32, #tpu.memory_space<vmem>>, vector<1x1x128xf32>
    %43 = vector.shape_cast %42 : vector<1x1x128xf32> to vector<1x128xf32>
    %44 = arith.addf %41, %43 : vector<1x128xf32>
    %c0_36 = arith.constant 0 : index
    %c3 = arith.constant 3 : index
    %c0_37 = arith.constant 0 : index
    %45 = vector.load %arg1[%c0_36, %c3, %c0_37] : memref<1x16x128xf32, #tpu.memory_space<vmem>>, vector<1x1x128xf32>
    %46 = vector.shape_cast %45 : vector<1x1x128xf32> to vector<1x128xf32>
    %c0_38 = arith.constant 0 : index
    %c3_39 = arith.constant 3 : index
    %c0_40 = arith.constant 0 : index
    %47 = vector.load %arg2[%c0_38, %c3_39, %c0_40] : memref<1x16x128xf32, #tpu.memory_space<vmem>>, vector<1x1x128xf32>
    %48 = vector.shape_cast %47 : vector<1x1x128xf32> to vector<1x128xf32>
    %49 = arith.addf %46, %48 : vector<1x128xf32>
    %50 = arith.addf %44, %49 : vector<1x128xf32>
    %51 = arith.maximumf %44, %49 : vector<1x128xf32>
    %cst_41 = arith.constant 5.000000e-01 : f32
    %52 = vector.broadcast %cst_41 : f32 to vector<1x128xf32>
    %53 = arith.mulf %50, %52 : vector<1x128xf32>
    %54 = arith.addf %53, %51 : vector<1x128xf32>
    %cst_42 = arith.constant 5.000000e-01 : f32
    %55 = vector.broadcast %cst_42 : f32 to vector<1x128xf32>
    %56 = arith.mulf %54, %55 : vector<1x128xf32>
    %c0_43 = arith.constant 0 : index
    %c2_44 = arith.constant 2 : index
    %c0_45 = arith.constant 0 : index
    %57 = vector.load %arg3[%c0_43, %c2_44, %c0_45] : memref<1x12x128xf32, #tpu.memory_space<vmem>>, vector<1x1x128xf32>
    %58 = vector.shape_cast %57 : vector<1x1x128xf32> to vector<1x128xf32>
    %59 = vector.shape_cast %56 : vector<1x128xf32> to vector<1x1x128xf32>
    tpu.vector_store %arg3[%c0_43, %c2_44, %c0_45], %59 {strides = array<i32>} : memref<1x12x128xf32, #tpu.memory_space<vmem>>, vector<1x1x128xf32>,
    %c0_46 = arith.constant 0 : index
    %c4 = arith.constant 4 : index
    %c0_47 = arith.constant 0 : index
    %60 = vector.load %arg1[%c0_46, %c4, %c0_47] : memref<1x16x128xf32, #tpu.memory_space<vmem>>, vector<1x1x128xf32>
    %61 = vector.shape_cast %60 : vector<1x1x128xf32> to vector<1x128xf32>
    %c0_48 = arith.constant 0 : index
    %c4_49 = arith.constant 4 : index
    %c0_50 = arith.constant 0 : index
    %62 = vector.load %arg2[%c0_48, %c4_49, %c0_50] : memref<1x16x128xf32, #tpu.memory_space<vmem>>, vector<1x1x128xf32>
    %63 = vector.shape_cast %62 : vector<1x1x128xf32> to vector<1x128xf32>
    %64 = arith.addf %61, %63 : vector<1x128xf32>
    %c0_51 = arith.constant 0 : index
    %c5 = arith.constant 5 : index
    %c0_52 = arith.constant 0 : index
    %65 = vector.load %arg1[%c0_51, %c5, %c0_52] : memref<1x16x128xf32, #tpu.memory_space<vmem>>, vector<1x1x128xf32>
    %66 = vector.shape_cast %65 : vector<1x1x128xf32> to vector<1x128xf32>
    %c0_53 = arith.constant 0 : index
    %c5_54 = arith.constant 5 : index
    %c0_55 = arith.constant 0 : index
    %67 = vector.load %arg2[%c0_53, %c5_54, %c0_55] : memref<1x16x128xf32, #tpu.memory_space<vmem>>, vector<1x1x128xf32>
    %68 = vector.shape_cast %67 : vector<1x1x128xf32> to vector<1x128xf32>
    %69 = arith.addf %66, %68 : vector<1x128xf32>
    %70 = arith.addf %64, %69 : vector<1x128xf32>
    %71 = arith.maximumf %64, %69 : vector<1x128xf32>
    %cst_56 = arith.constant 5.000000e-01 : f32
    %72 = vector.broadcast %cst_56 : f32 to vector<1x128xf32>
    %73 = arith.mulf %70, %72 : vector<1x128xf32>
    %74 = arith.addf %73, %71 : vector<1x128xf32>
    %cst_57 = arith.constant 5.000000e-01 : f32
    %75 = vector.broadcast %cst_57 : f32 to vector<1x128xf32>
    %76 = arith.mulf %74, %75 : vector<1x128xf32>
    %c0_58 = arith.constant 0 : index
    %c3_59 = arith.constant 3 : index
    %c0_60 = arith.constant 0 : index
    %77 = vector.load %arg3[%c0_58, %c3_59, %c0_60] : memref<1x12x128xf32, #tpu.memory_space<vmem>>, vector<1x1x128xf32>
    %78 = vector.shape_cast %77 : vector<1x1x128xf32> to vector<1x128xf32>
    %79 = vector.shape_cast %76 : vector<1x128xf32> to vector<1x1x128xf32>
    tpu.vector_store %arg3[%c0_58, %c3_59, %c0_60], %79 {strides = array<i32>} : memref<1x12x128xf32, #tpu.memory_space<vmem>>, vector<1x1x128xf32>,
    %c0_61 = arith.constant 0 : index
    %c5_62 = arith.constant 5 : index
    %c0_63 = arith.constant 0 : index
    %80 = vector.load %arg1[%c0_61, %c5_62, %c0_63] : memref<1x16x128xf32, #tpu.memory_space<vmem>>, vector<1x1x128xf32>
    %81 = vector.shape_cast %80 : vector<1x1x128xf32> to vector<1x128xf32>
    %c0_64 = arith.constant 0 : index
    %c5_65 = arith.constant 5 : index
    %c0_66 = arith.constant 0 : index
    %82 = vector.load %arg2[%c0_64, %c5_65, %c0_66] : memref<1x16x128xf32, #tpu.memory_space<vmem>>, vector<1x1x128xf32>
    %83 = vector.shape_cast %82 : vector<1x1x128xf32> to vector<1x128xf32>
    %84 = arith.addf %81, %83 : vector<1x128xf32>
    %c0_67 = arith.constant 0 : index
    %c6 = arith.constant 6 : index
    %c0_68 = arith.constant 0 : index
    %85 = vector.load %arg1[%c0_67, %c6, %c0_68] : memref<1x16x128xf32, #tpu.memory_space<vmem>>, vector<1x1x128xf32>
    %86 = vector.shape_cast %85 : vector<1x1x128xf32> to vector<1x128xf32>
    %c0_69 = arith.constant 0 : index
    %c6_70 = arith.constant 6 : index
    %c0_71 = arith.constant 0 : index
    %87 = vector.load %arg2[%c0_69, %c6_70, %c0_71] : memref<1x16x128xf32, #tpu.memory_space<vmem>>, vector<1x1x128xf32>
    %88 = vector.shape_cast %87 : vector<1x1x128xf32> to vector<1x128xf32>
    %89 = arith.addf %86, %88 : vector<1x128xf32>
    %90 = arith.addf %84, %89 : vector<1x128xf32>
    %91 = arith.maximumf %84, %89 : vector<1x128xf32>
    %cst_72 = arith.constant 5.000000e-01 : f32
    %92 = vector.broadcast %cst_72 : f32 to vector<1x128xf32>
    %93 = arith.mulf %90, %92 : vector<1x128xf32>
    %94 = arith.addf %93, %91 : vector<1x128xf32>
    %cst_73 = arith.constant 5.000000e-01 : f32
    %95 = vector.broadcast %cst_73 : f32 to vector<1x128xf32>
    %96 = arith.mulf %94, %95 : vector<1x128xf32>
    %c0_74 = arith.constant 0 : index
    %c4_75 = arith.constant 4 : index
    %c0_76 = arith.constant 0 : index
    %97 = vector.load %arg3[%c0_74, %c4_75, %c0_76] : memref<1x12x128xf32, #tpu.memory_space<vmem>>, vector<1x1x128xf32>
    %98 = vector.shape_cast %97 : vector<1x1x128xf32> to vector<1x128xf32>
    %99 = vector.shape_cast %96 : vector<1x128xf32> to vector<1x1x128xf32>
    tpu.vector_store %arg3[%c0_74, %c4_75, %c0_76], %99 {strides = array<i32>} : memref<1x12x128xf32, #tpu.memory_space<vmem>>, vector<1x1x128xf32>,
    %c0_77 = arith.constant 0 : index
    %c6_78 = arith.constant 6 : index
    %c0_79 = arith.constant 0 : index
    %100 = vector.load %arg1[%c0_77, %c6_78, %c0_79] : memref<1x16x128xf32, #tpu.memory_space<vmem>>, vector<1x1x128xf32>
    %101 = vector.shape_cast %100 : vector<1x1x128xf32> to vector<1x128xf32>
    %c0_80 = arith.constant 0 : index
    %c6_81 = arith.constant 6 : index
    %c0_82 = arith.constant 0 : index
    %102 = vector.load %arg2[%c0_80, %c6_81, %c0_82] : memref<1x16x128xf32, #tpu.memory_space<vmem>>, vector<1x1x128xf32>
    %103 = vector.shape_cast %102 : vector<1x1x128xf32> to vector<1x128xf32>
    %104 = arith.addf %101, %103 : vector<1x128xf32>
    %c0_83 = arith.constant 0 : index
    %c7 = arith.constant 7 : index
    %c0_84 = arith.constant 0 : index
    %105 = vector.load %arg1[%c0_83, %c7, %c0_84] : memref<1x16x128xf32, #tpu.memory_space<vmem>>, vector<1x1x128xf32>
    %106 = vector.shape_cast %105 : vector<1x1x128xf32> to vector<1x128xf32>
    %c0_85 = arith.constant 0 : index
    %c7_86 = arith.constant 7 : index
    %c0_87 = arith.constant 0 : index
    %107 = vector.load %arg2[%c0_85, %c7_86, %c0_87] : memref<1x16x128xf32, #tpu.memory_space<vmem>>, vector<1x1x128xf32>
    %108 = vector.shape_cast %107 : vector<1x1x128xf32> to vector<1x128xf32>
    %109 = arith.addf %106, %108 : vector<1x128xf32>
    %110 = arith.addf %104, %109 : vector<1x128xf32>
    %111 = arith.maximumf %104, %109 : vector<1x128xf32>
    %cst_88 = arith.constant 5.000000e-01 : f32
    %112 = vector.broadcast %cst_88 : f32 to vector<1x128xf32>
    %113 = arith.mulf %110, %112 : vector<1x128xf32>
    %114 = arith.addf %113, %111 : vector<1x128xf32>
    %cst_89 = arith.constant 5.000000e-01 : f32
    %115 = vector.broadcast %cst_89 : f32 to vector<1x128xf32>
    %116 = arith.mulf %114, %115 : vector<1x128xf32>
    %c0_90 = arith.constant 0 : index
    %c5_91 = arith.constant 5 : index
    %c0_92 = arith.constant 0 : index
    %117 = vector.load %arg3[%c0_90, %c5_91, %c0_92] : memref<1x12x128xf32, #tpu.memory_space<vmem>>, vector<1x1x128xf32>
    %118 = vector.shape_cast %117 : vector<1x1x128xf32> to vector<1x128xf32>
    %119 = vector.shape_cast %116 : vector<1x128xf32> to vector<1x1x128xf32>
    tpu.vector_store %arg3[%c0_90, %c5_91, %c0_92], %119 {strides = array<i32>} : memref<1x12x128xf32, #tpu.memory_space<vmem>>, vector<1x1x128xf32>,
    %c0_93 = arith.constant 0 : index
    %c8 = arith.constant 8 : index
    %c0_94 = arith.constant 0 : index
    %120 = vector.load %arg1[%c0_93, %c8, %c0_94] : memref<1x16x128xf32, #tpu.memory_space<vmem>>, vector<1x1x128xf32>
    %121 = vector.shape_cast %120 : vector<1x1x128xf32> to vector<1x128xf32>
    %c0_95 = arith.constant 0 : index
    %c8_96 = arith.constant 8 : index
    %c0_97 = arith.constant 0 : index
    %122 = vector.load %arg2[%c0_95, %c8_96, %c0_97] : memref<1x16x128xf32, #tpu.memory_space<vmem>>, vector<1x1x128xf32>
    %123 = vector.shape_cast %122 : vector<1x1x128xf32> to vector<1x128xf32>
    %124 = arith.addf %121, %123 : vector<1x128xf32>
    %c0_98 = arith.constant 0 : index
    %c9 = arith.constant 9 : index
    %c0_99 = arith.constant 0 : index
    %125 = vector.load %arg1[%c0_98, %c9, %c0_99] : memref<1x16x128xf32, #tpu.memory_space<vmem>>, vector<1x1x128xf32>
    %126 = vector.shape_cast %125 : vector<1x1x128xf32> to vector<1x128xf32>
    %c0_100 = arith.constant 0 : index
    %c9_101 = arith.constant 9 : index
    %c0_102 = arith.constant 0 : index
    %127 = vector.load %arg2[%c0_100, %c9_101, %c0_102] : memref<1x16x128xf32, #tpu.memory_space<vmem>>, vector<1x1x128xf32>
    %128 = vector.shape_cast %127 : vector<1x1x128xf32> to vector<1x128xf32>
    %129 = arith.addf %126, %128 : vector<1x128xf32>
    %130 = arith.addf %124, %129 : vector<1x128xf32>
    %131 = arith.maximumf %124, %129 : vector<1x128xf32>
    %cst_103 = arith.constant 5.000000e-01 : f32
    %132 = vector.broadcast %cst_103 : f32 to vector<1x128xf32>
    %133 = arith.mulf %130, %132 : vector<1x128xf32>
    %134 = arith.addf %133, %131 : vector<1x128xf32>
    %cst_104 = arith.constant 5.000000e-01 : f32
    %135 = vector.broadcast %cst_104 : f32 to vector<1x128xf32>
    %136 = arith.mulf %134, %135 : vector<1x128xf32>
    %c0_105 = arith.constant 0 : index
    %c6_106 = arith.constant 6 : index
    %c0_107 = arith.constant 0 : index
    %137 = vector.load %arg3[%c0_105, %c6_106, %c0_107] : memref<1x12x128xf32, #tpu.memory_space<vmem>>, vector<1x1x128xf32>
    %138 = vector.shape_cast %137 : vector<1x1x128xf32> to vector<1x128xf32>
    %139 = vector.shape_cast %136 : vector<1x128xf32> to vector<1x1x128xf32>
    tpu.vector_store %arg3[%c0_105, %c6_106, %c0_107], %139 {strides = array<i32>} : memref<1x12x128xf32, #tpu.memory_space<vmem>>, vector<1x1x128xf32>,
    %c0_108 = arith.constant 0 : index
    %c9_109 = arith.constant 9 : index
    %c0_110 = arith.constant 0 : index
    %140 = vector.load %arg1[%c0_108, %c9_109, %c0_110] : memref<1x16x128xf32, #tpu.memory_space<vmem>>, vector<1x1x128xf32>
    %141 = vector.shape_cast %140 : vector<1x1x128xf32> to vector<1x128xf32>
    %c0_111 = arith.constant 0 : index
    %c9_112 = arith.constant 9 : index
    %c0_113 = arith.constant 0 : index
    %142 = vector.load %arg2[%c0_111, %c9_112, %c0_113] : memref<1x16x128xf32, #tpu.memory_space<vmem>>, vector<1x1x128xf32>
    %143 = vector.shape_cast %142 : vector<1x1x128xf32> to vector<1x128xf32>
    %144 = arith.addf %141, %143 : vector<1x128xf32>
    %c0_114 = arith.constant 0 : index
    %c10 = arith.constant 10 : index
    %c0_115 = arith.constant 0 : index
    %145 = vector.load %arg1[%c0_114, %c10, %c0_115] : memref<1x16x128xf32, #tpu.memory_space<vmem>>, vector<1x1x128xf32>
    %146 = vector.shape_cast %145 : vector<1x1x128xf32> to vector<1x128xf32>
    %c0_116 = arith.constant 0 : index
    %c10_117 = arith.constant 10 : index
    %c0_118 = arith.constant 0 : index
    %147 = vector.load %arg2[%c0_116, %c10_117, %c0_118] : memref<1x16x128xf32, #tpu.memory_space<vmem>>, vector<1x1x128xf32>
    %148 = vector.shape_cast %147 : vector<1x1x128xf32> to vector<1x128xf32>
    %149 = arith.addf %146, %148 : vector<1x128xf32>
    %150 = arith.addf %144, %149 : vector<1x128xf32>
    %151 = arith.maximumf %144, %149 : vector<1x128xf32>
    %cst_119 = arith.constant 5.000000e-01 : f32
    %152 = vector.broadcast %cst_119 : f32 to vector<1x128xf32>
    %153 = arith.mulf %150, %152 : vector<1x128xf32>
    %154 = arith.addf %153, %151 : vector<1x128xf32>
    %cst_120 = arith.constant 5.000000e-01 : f32
    %155 = vector.broadcast %cst_120 : f32 to vector<1x128xf32>
    %156 = arith.mulf %154, %155 : vector<1x128xf32>
    %c0_121 = arith.constant 0 : index
    %c7_122 = arith.constant 7 : index
    %c0_123 = arith.constant 0 : index
    %157 = vector.load %arg3[%c0_121, %c7_122, %c0_123] : memref<1x12x128xf32, #tpu.memory_space<vmem>>, vector<1x1x128xf32>
    %158 = vector.shape_cast %157 : vector<1x1x128xf32> to vector<1x128xf32>
    %159 = vector.shape_cast %156 : vector<1x128xf32> to vector<1x1x128xf32>
    tpu.vector_store %arg3[%c0_121, %c7_122, %c0_123], %159 {strides = array<i32>} : memref<1x12x128xf32, #tpu.memory_space<vmem>>, vector<1x1x128xf32>,
    %c0_124 = arith.constant 0 : index
    %c10_125 = arith.constant 10 : index
    %c0_126 = arith.constant 0 : index
    %160 = vector.load %arg1[%c0_124, %c10_125, %c0_126] : memref<1x16x128xf32, #tpu.memory_space<vmem>>, vector<1x1x128xf32>
    %161 = vector.shape_cast %160 : vector<1x1x128xf32> to vector<1x128xf32>
    %c0_127 = arith.constant 0 : index
    %c10_128 = arith.constant 10 : index
    %c0_129 = arith.constant 0 : index
    %162 = vector.load %arg2[%c0_127, %c10_128, %c0_129] : memref<1x16x128xf32, #tpu.memory_space<vmem>>, vector<1x1x128xf32>
    %163 = vector.shape_cast %162 : vector<1x1x128xf32> to vector<1x128xf32>
    %164 = arith.addf %161, %163 : vector<1x128xf32>
    %c0_130 = arith.constant 0 : index
    %c11 = arith.constant 11 : index
    %c0_131 = arith.constant 0 : index
    %165 = vector.load %arg1[%c0_130, %c11, %c0_131] : memref<1x16x128xf32, #tpu.memory_space<vmem>>, vector<1x1x128xf32>
    %166 = vector.shape_cast %165 : vector<1x1x128xf32> to vector<1x128xf32>
    %c0_132 = arith.constant 0 : index
    %c11_133 = arith.constant 11 : index
    %c0_134 = arith.constant 0 : index
    %167 = vector.load %arg2[%c0_132, %c11_133, %c0_134] : memref<1x16x128xf32, #tpu.memory_space<vmem>>, vector<1x1x128xf32>
    %168 = vector.shape_cast %167 : vector<1x1x128xf32> to vector<1x128xf32>
    %169 = arith.addf %166, %168 : vector<1x128xf32>
    %170 = arith.addf %164, %169 : vector<1x128xf32>
    %171 = arith.maximumf %164, %169 : vector<1x128xf32>
    %cst_135 = arith.constant 5.000000e-01 : f32
    %172 = vector.broadcast %cst_135 : f32 to vector<1x128xf32>
    %173 = arith.mulf %170, %172 : vector<1x128xf32>
    %174 = arith.addf %173, %171 : vector<1x128xf32>
    %cst_136 = arith.constant 5.000000e-01 : f32
    %175 = vector.broadcast %cst_136 : f32 to vector<1x128xf32>
    %176 = arith.mulf %174, %175 : vector<1x128xf32>
    %c0_137 = arith.constant 0 : index
    %c8_138 = arith.constant 8 : index
    %c0_139 = arith.constant 0 : index
    %177 = vector.load %arg3[%c0_137, %c8_138, %c0_139] : memref<1x12x128xf32, #tpu.memory_space<vmem>>, vector<1x1x128xf32>
    %178 = vector.shape_cast %177 : vector<1x1x128xf32> to vector<1x128xf32>
    %179 = vector.shape_cast %176 : vector<1x128xf32> to vector<1x1x128xf32>
    tpu.vector_store %arg3[%c0_137, %c8_138, %c0_139], %179 {strides = array<i32>} : memref<1x12x128xf32, #tpu.memory_space<vmem>>, vector<1x1x128xf32>,
    %c0_140 = arith.constant 0 : index
    %c12 = arith.constant 12 : index
    %c0_141 = arith.constant 0 : index
    %180 = vector.load %arg1[%c0_140, %c12, %c0_141] : memref<1x16x128xf32, #tpu.memory_space<vmem>>, vector<1x1x128xf32>
    %181 = vector.shape_cast %180 : vector<1x1x128xf32> to vector<1x128xf32>
    %c0_142 = arith.constant 0 : index
    %c12_143 = arith.constant 12 : index
    %c0_144 = arith.constant 0 : index
    %182 = vector.load %arg2[%c0_142, %c12_143, %c0_144] : memref<1x16x128xf32, #tpu.memory_space<vmem>>, vector<1x1x128xf32>
    %183 = vector.shape_cast %182 : vector<1x1x128xf32> to vector<1x128xf32>
    %184 = arith.addf %181, %183 : vector<1x128xf32>
    %c0_145 = arith.constant 0 : index
    %c13 = arith.constant 13 : index
    %c0_146 = arith.constant 0 : index
    %185 = vector.load %arg1[%c0_145, %c13, %c0_146] : memref<1x16x128xf32, #tpu.memory_space<vmem>>, vector<1x1x128xf32>
    %186 = vector.shape_cast %185 : vector<1x1x128xf32> to vector<1x128xf32>
    %c0_147 = arith.constant 0 : index
    %c13_148 = arith.constant 13 : index
    %c0_149 = arith.constant 0 : index
    %187 = vector.load %arg2[%c0_147, %c13_148, %c0_149] : memref<1x16x128xf32, #tpu.memory_space<vmem>>, vector<1x1x128xf32>
    %188 = vector.shape_cast %187 : vector<1x1x128xf32> to vector<1x128xf32>
    %189 = arith.addf %186, %188 : vector<1x128xf32>
    %190 = arith.addf %184, %189 : vector<1x128xf32>
    %191 = arith.maximumf %184, %189 : vector<1x128xf32>
    %cst_150 = arith.constant 5.000000e-01 : f32
    %192 = vector.broadcast %cst_150 : f32 to vector<1x128xf32>
    %193 = arith.mulf %190, %192 : vector<1x128xf32>
    %194 = arith.addf %193, %191 : vector<1x128xf32>
    %cst_151 = arith.constant 5.000000e-01 : f32
    %195 = vector.broadcast %cst_151 : f32 to vector<1x128xf32>
    %196 = arith.mulf %194, %195 : vector<1x128xf32>
    %c0_152 = arith.constant 0 : index
    %c9_153 = arith.constant 9 : index
    %c0_154 = arith.constant 0 : index
    %197 = vector.load %arg3[%c0_152, %c9_153, %c0_154] : memref<1x12x128xf32, #tpu.memory_space<vmem>>, vector<1x1x128xf32>
    %198 = vector.shape_cast %197 : vector<1x1x128xf32> to vector<1x128xf32>
    %199 = vector.shape_cast %196 : vector<1x128xf32> to vector<1x1x128xf32>
    tpu.vector_store %arg3[%c0_152, %c9_153, %c0_154], %199 {strides = array<i32>} : memref<1x12x128xf32, #tpu.memory_space<vmem>>, vector<1x1x128xf32>,
    %c0_155 = arith.constant 0 : index
    %c13_156 = arith.constant 13 : index
    %c0_157 = arith.constant 0 : index
    %200 = vector.load %arg1[%c0_155, %c13_156, %c0_157] : memref<1x16x128xf32, #tpu.memory_space<vmem>>, vector<1x1x128xf32>
    %201 = vector.shape_cast %200 : vector<1x1x128xf32> to vector<1x128xf32>
    %c0_158 = arith.constant 0 : index
    %c13_159 = arith.constant 13 : index
    %c0_160 = arith.constant 0 : index
    %202 = vector.load %arg2[%c0_158, %c13_159, %c0_160] : memref<1x16x128xf32, #tpu.memory_space<vmem>>, vector<1x1x128xf32>
    %203 = vector.shape_cast %202 : vector<1x1x128xf32> to vector<1x128xf32>
    %204 = arith.addf %201, %203 : vector<1x128xf32>
    %c0_161 = arith.constant 0 : index
    %c14 = arith.constant 14 : index
    %c0_162 = arith.constant 0 : index
    %205 = vector.load %arg1[%c0_161, %c14, %c0_162] : memref<1x16x128xf32, #tpu.memory_space<vmem>>, vector<1x1x128xf32>
    %206 = vector.shape_cast %205 : vector<1x1x128xf32> to vector<1x128xf32>
    %c0_163 = arith.constant 0 : index
    %c14_164 = arith.constant 14 : index
    %c0_165 = arith.constant 0 : index
    %207 = vector.load %arg2[%c0_163, %c14_164, %c0_165] : memref<1x16x128xf32, #tpu.memory_space<vmem>>, vector<1x1x128xf32>
    %208 = vector.shape_cast %207 : vector<1x1x128xf32> to vector<1x128xf32>
    %209 = arith.addf %206, %208 : vector<1x128xf32>
    %210 = arith.addf %204, %209 : vector<1x128xf32>
    %211 = arith.maximumf %204, %209 : vector<1x128xf32>
    %cst_166 = arith.constant 5.000000e-01 : f32
    %212 = vector.broadcast %cst_166 : f32 to vector<1x128xf32>
    %213 = arith.mulf %210, %212 : vector<1x128xf32>
    %214 = arith.addf %213, %211 : vector<1x128xf32>
    %cst_167 = arith.constant 5.000000e-01 : f32
    %215 = vector.broadcast %cst_167 : f32 to vector<1x128xf32>
    %216 = arith.mulf %214, %215 : vector<1x128xf32>
    %c0_168 = arith.constant 0 : index
    %c10_169 = arith.constant 10 : index
    %c0_170 = arith.constant 0 : index
    %217 = vector.load %arg3[%c0_168, %c10_169, %c0_170] : memref<1x12x128xf32, #tpu.memory_space<vmem>>, vector<1x1x128xf32>
    %218 = vector.shape_cast %217 : vector<1x1x128xf32> to vector<1x128xf32>
    %219 = vector.shape_cast %216 : vector<1x128xf32> to vector<1x1x128xf32>
    tpu.vector_store %arg3[%c0_168, %c10_169, %c0_170], %219 {strides = array<i32>} : memref<1x12x128xf32, #tpu.memory_space<vmem>>, vector<1x1x128xf32>,
    %c0_171 = arith.constant 0 : index
    %c14_172 = arith.constant 14 : index
    %c0_173 = arith.constant 0 : index
    %220 = vector.load %arg1[%c0_171, %c14_172, %c0_173] : memref<1x16x128xf32, #tpu.memory_space<vmem>>, vector<1x1x128xf32>
    %221 = vector.shape_cast %220 : vector<1x1x128xf32> to vector<1x128xf32>
    %c0_174 = arith.constant 0 : index
    %c14_175 = arith.constant 14 : index
    %c0_176 = arith.constant 0 : index
    %222 = vector.load %arg2[%c0_174, %c14_175, %c0_176] : memref<1x16x128xf32, #tpu.memory_space<vmem>>, vector<1x1x128xf32>
    %223 = vector.shape_cast %222 : vector<1x1x128xf32> to vector<1x128xf32>
    %224 = arith.addf %221, %223 : vector<1x128xf32>
    %c0_177 = arith.constant 0 : index
    %c15 = arith.constant 15 : index
    %c0_178 = arith.constant 0 : index
    %225 = vector.load %arg1[%c0_177, %c15, %c0_178] : memref<1x16x128xf32, #tpu.memory_space<vmem>>, vector<1x1x128xf32>
    %226 = vector.shape_cast %225 : vector<1x1x128xf32> to vector<1x128xf32>
    %c0_179 = arith.constant 0 : index
    %c15_180 = arith.constant 15 : index
    %c0_181 = arith.constant 0 : index
    %227 = vector.load %arg2[%c0_179, %c15_180, %c0_181] : memref<1x16x128xf32, #tpu.memory_space<vmem>>, vector<1x1x128xf32>
    %228 = vector.shape_cast %227 : vector<1x1x128xf32> to vector<1x128xf32>
    %229 = arith.addf %226, %228 : vector<1x128xf32>
    %230 = arith.addf %224, %229 : vector<1x128xf32>
    %231 = arith.maximumf %224, %229 : vector<1x128xf32>
    %cst_182 = arith.constant 5.000000e-01 : f32
    %232 = vector.broadcast %cst_182 : f32 to vector<1x128xf32>
    %233 = arith.mulf %230, %232 : vector<1x128xf32>
    %234 = arith.addf %233, %231 : vector<1x128xf32>
    %cst_183 = arith.constant 5.000000e-01 : f32
    %235 = vector.broadcast %cst_183 : f32 to vector<1x128xf32>
    %236 = arith.mulf %234, %235 : vector<1x128xf32>
    %c0_184 = arith.constant 0 : index
    %c11_185 = arith.constant 11 : index
    %c0_186 = arith.constant 0 : index
    %237 = vector.load %arg3[%c0_184, %c11_185, %c0_186] : memref<1x12x128xf32, #tpu.memory_space<vmem>>, vector<1x1x128xf32>
    %238 = vector.shape_cast %237 : vector<1x1x128xf32> to vector<1x128xf32>
    %239 = vector.shape_cast %236 : vector<1x128xf32> to vector<1x1x128xf32>
    tpu.vector_store %arg3[%c0_184, %c11_185, %c0_186], %239 {strides = array<i32>} : memref<1x12x128xf32, #tpu.memory_space<vmem>>, vector<1x1x128xf32>,
    return
  }
  func.func @transform_0(%arg0: i32) -> (i32, i32, i32) {
    %c0_i32 = arith.constant 0 : i32
    %c0_i32_0 = arith.constant 0 : i32
    %c0_i32_1 = arith.constant 0 : i32
    return %arg0, %c0_i32, %c0_i32_0 : i32, i32, i32
  }
  func.func @transform_1(%arg0: i32) -> (i32, i32, i32) {
    %c0_i32 = arith.constant 0 : i32
    %c0_i32_0 = arith.constant 0 : i32
    %c0_i32_1 = arith.constant 0 : i32
    %c0_i32_2 = arith.constant 0 : i32
    return %c0_i32, %c0_i32_0, %c0_i32_1 : i32, i32, i32
  }
  func.func @transform_2(%arg0: i32) -> (i32, i32, i32) {
    %c0_i32 = arith.constant 0 : i32
    %c0_i32_0 = arith.constant 0 : i32
    %c0_i32_1 = arith.constant 0 : i32
    return %arg0, %c0_i32, %c0_i32_0 : i32, i32, i32
  }
}

</mosaic_0001>

<bundles_post_ra>
// kernel: tpu_custom_call.1
= control target key start
LH: loop header
LB: loop body
LE: loop exit
PB: predicated region body
PF: predicated region fallthrough
CT: control target
= control target key end

     0   :  { %7 = vsyncpa [#allocation3], 0  ;;  %s756_s0 = inlined_call_operand.hbm [shape: f32[2,16,128], index: 0, kind: input, shape index: {}]   ;;  %s757_s1 = inlined_call_operand.hbm [shape: f32[1,16,128], index: 1, kind: input, shape index: {}]   ;;  %s758_s2 = inlined_call_operand.vmem [shape: f32[2,12,128], index: 2, kind: output, shape index: {}]  }
   0x1   :  { %9 = vsyncpa [#allocation3 + $0x1], 0 }
   0x2   :  { %10 = vsyncpa [#allocation5], 0  ;;  %s581_s9 = smov 0   ;;  %s583_s10 = smov 0  }
   0x3   :  { %s585_s11 = smov 0   ;;  %s587_s12 = smov 0  }
   0x4 LB: > { %s600_s13 = sadd.s32 4294967295, %s560_s12   ;;  %p36_p0 = scmp.ne.s32.totalorder %s552_s10, %s548_s9  ;;  %s560_s12 = sphi %s587_s12, %s773_s12   ;;  %s556_s11 = sphi %s585_s11, %s772_s11   ;;  %s552_s10 = sphi %s583_s10, %s771_s10   ;;  %s548_s9 = sphi %s581_s9, %s770_s9  }
   0x5   : > { %p759_p1 = scmp.eq.s32.totalorder %s600_s13, 0  ;;  %p401_p2 = scmp.ge.s32.totalorder %s560_s12, 1 }
   0x6   : > { %p94_p3 = scmp.lt.s32.totalorder %s560_s12, 3  ;;  %s562_s16 = smov [#allocation4]  }
   0x7   : > { %p608_p4 = por %p759_p1, %p36_p0  ;;  %s106_s17 = sshll.u32 %s562_s16, 4  ;;  %s107_s17 = int_to_ptr.vmem [resolvable:$true] %s106_s17 }
   0x8   : > { %p612_p5 = pnand %p401_p2, %p94_p3  ;;  %s625_s19 = sadd.s32 1, %s560_s12  }
   0x9   : > { %s762_s14 = scalar_select %p608_p4, 1, 0 }
   0xa   : > { %s763_s15 = scalar_select %p612_p5, 1, 0 }
   0xb   : > { %p422_p6 = pneg %p612_p5  ;;  %s23_s20 = sadd.s32 1, %s556_s11 }
   0xc   : > { %s20_s21 = ssub.s32 %s560_s12, %s625_s19  ;;  %s479_s22 = scalar_lea.vmem %s107_s17, 256 }
   0xd   : > { %p620_p7 = pnand %p422_p6, %p759_p1  ;;  %p480_p9 = scmp.ne.s32.totalorder %s107_s17, %s479_s22 }
   0xe   : > { %p487_p12 = scmp.lt.s32.totalorder %s107_s17, %s107_s17  ;;  %p488_p13 = scmp.lt.s32.totalorder %s479_s22, %s479_s22 }
   0xf   : > { %p470_p8 = pneg %p620_p7 }
  0x10   : > { %p489_p0 = por %p488_p13, %p487_p12 }
  0x11   : > { %p482_p10 = pnand %p480_p9, %p470_p8 }
  0x13   : > { %p483_p11 = pneg %p482_p10 }
  0x15   : > { %p490_p2 = pnand %p489_p0, %p483_p11 }
  0x17   : > { %493 = shalt.err (!%p490_p2)
}
  0x18   : > { %s563_s23 = smov 128   ;;  %s564_s24 = smov 8  }
  0x19   : > { %425 = dma.hbm_to_vmem [thread:$0]  (!%p620_p7), %s757_s1, 256, %s107_s17, [#allocation5], %s563_s23, %s563_s23, %s564_s24  }
  0x1a   : > { %p21_p3 = scmp.eq.s32.totalorder %s20_s21, 0  ;;  %p30_p6 = scmp.ne.s32.totalorder %s556_s11, %s552_s10 }
  0x1b   : > { %p31_p8 = scmp.eq.s32.totalorder %s560_s12, 0  ;;  %p431_p9 = scmp.lt.s32.totalorder %s560_s12, 2 }
  0x1c   : > { %s645_s27 = scalar_select %p21_p3, %s556_s11, %s23_s20  }
  0x1d   : > { %p32_p10 = por %p31_p8, %p30_p6  ;;  %s120_s28 = sand.u32 1, %s556_s11  }
  0x1e   : > { %s404_s29 = sshll.u32 %s120_s28, 4  ;;  %s414_s30 = sshll.u32 %s560_s12, 8 }
  0x1f   : > { %s652_s5 = scalar_lea.hbm %s756_s0, %s414_s30  ;;  %s124_s6 = scalar_lea.vmem [#allocation2], %s404_s29 }
  0x20   : > { %s131_s7 = sshll.u32 %s124_s6, 4  ;;  %p656_p7 = pnand %p431_p9, %p32_p10  ;;  %s654_s7 = int_to_ptr.vmem [resolvable:$true] %s131_s7 }
  0x21   : > { %s660_s9 = scalar_lea.sflag [#allocation3], %s120_s28  ;;  %s494_s12 = scalar_lea.hbm %s652_s5, 256 }
  0x22   : > { %p495_p11 = scmp.ne.s32.totalorder %s652_s5, %s494_s12  ;;  %p496_p12 = pneg %p656_p7 }
  0x23   : > { %s499_s18 = scalar_lea.hbm %s756_s0, 512  ;;  %p500_p2 = scmp.lt.s32.totalorder %s652_s5, %s756_s0 }
  0x24   : > { %p497_p13 = pnand %p496_p12, %p495_p11  ;;  %p501_p3 = scmp.lt.s32.totalorder %s499_s18, %s494_s12 }
  0x26   : > { %p498_p0 = pneg %p497_p13  ;;  %p502_p6 = por %p501_p3, %p500_p2 }
  0x28   : > { %p503_p8 = pnand %p502_p6, %p498_p0 }
  0x2a   : > { %506 = shalt.err (!%p503_p8)
}
  0x2b   : > { %s507_s22 = scalar_lea.vmem %s654_s7, 256  ;;  %s565_s25 = smov [#allocation2]  }
  0x2c   : > { %p508_p9 = scmp.ne.s32.totalorder %s654_s7, %s507_s22  ;;  %s512_s26 = sshll.u32 %s565_s25, 4  ;;  %s513_s26 = int_to_ptr.vmem [resolvable:$false] %s512_s26 }
  0x2d   : > { %s514_s28 = scalar_lea.vmem %s513_s26, 512  ;;  %p515_p13 = scmp.lt.s32.totalorder %s654_s7, %s513_s26 }
  0x2e   : > { %p510_p10 = pnand %p508_p9, %p496_p12  ;;  %p516_p1 = scmp.lt.s32.totalorder %s514_s28, %s507_s22 }
  0x30   : > { %p511_p11 = pneg %p510_p10  ;;  %p517_p4 = por %p516_p1, %p515_p13 }
  0x32   : > { %p518_p5 = pnand %p517_p4, %p511_p11 }
  0x34   : > { %521 = shalt.err (!%p518_p5)
}
  0x35   : > { %429 = dma.hbm_to_vmem [thread:$0]  (!%p656_p7), %s652_s5, 256, %s654_s7, %s660_s9, %s563_s23, %s563_s23, %s564_s24  }
  0x36   : > { %p766_p12 = scmp.ne.s32.totalorder %s763_s15, 0 }
  0x37   : > { %s145_s29 = sand.u32 (!%p766_p12), 1, %s552_s10   ;;  %p767_p1 = scmp.ne.s32.totalorder (!%p766_p12), %s762_s14, 0 }
  0x38   : > { %143 = sbr.rel (%p766_p12) target bundleno = 99 (0x63), region = 28  ;;  %s408_s30 = sshll.u32 (!%p766_p12), %s145_s29, 4 }
  0x39   : > { %s146_s3 = scalar_lea.sflag (!%p766_p12), [#allocation3], %s145_s29  ;;  %s687_s4 = scalar_lea.vmem (!%p766_p12), [#allocation2], %s408_s30 }
  0x3d   : > { %539 = dma.done.wait (%p767_p1), %s146_s3, 256  }
  0x3e   : > { %541 = vsyncadd (%p767_p1), %s146_s3, 4294967040  ;;  %p768_p4 = scmp.eq.s32.totalorder %s600_s13, 0 }
  0x40   : > { %543 = dma.done.wait (%p768_p4), [#allocation5], 256   ;;  %p769_p5 = pmov %p768_p4 }
  0x41   : > { %p174_p7 = scmp.lt.s32.totalorder %s600_s13, 1  ;;  %v179_v0 = vld [vmem:[%s687_s4] sm:$0x1]  ;;  %v182_v2 = vld [vmem:[%s687_s4 + $0x1] sm:$0x1] }
  0x42   : > { %545 = vsyncadd (%p769_p5), [#allocation5], 4294967040  ;;  %v180_v1 = vld [vmem:[#allocation4] sm:$0x1]  ;;  %v183_v4 = vld [vmem:[#allocation4 + $0x1] sm:$0x1] }
  0x43   : > { %s775_s13 = smov (!%p174_p7, %s600_s13), 1  ;;  %v181_v3 = vadd.f32 %v180_v1, %v179_v0  ;;  %v191_v5 = vld [vmem:[%s687_s4 + $0x1] sm:$0x1]  ;;  %v184_v7 = vadd.f32 %v183_v4, %v182_v2  ;;  %v194_v9 = vld [vmem:[%s687_s4 + $0x2] sm:$0x1] }
  0x44   : > { %v192_v6 = vld [vmem:[#allocation4 + $0x1] sm:$0x1]  ;;  %v195_v10 = vld [vmem:[#allocation4 + $0x2] sm:$0x1]  ;;  %v206_v14 = vld [vmem:[%s687_s4 + $0x3] sm:$0x1] }
  0x45   : > { %v193_v8 = vadd.f32 %v192_v6, %v191_v5  ;;  %v203_v11 = vld [vmem:[%s687_s4 + $0x2] sm:$0x1]  ;;  %v196_v12 = vadd.f32 %v195_v10, %v194_v9  ;;  %v207_v15 = vld [vmem:[#allocation4 + $0x3] sm:$0x1]  ;;  %v185_v16 = vadd.f32 %v184_v7, %v181_v3  ;;  %v186_v17 = vmax.f32 %v181_v3, %v184_v7  ;;  %v215_v20 = vld [vmem:[%s687_s4 + $0x4] sm:$0x1] }
  0x46   : > { %v204_v13 = vld [vmem:[#allocation4 + $0x2] sm:$0x1]  ;;  %v208_v19 = vadd.f32 %v207_v15, %v206_v14  ;;  %v216_v21 = vld [vmem:[#allocation4 + $0x4] sm:$0x1]  ;;  %v218_v22 = vld [vmem:[%s687_s4 + $0x5] sm:$0x1] }
  0x47   : > { %v205_v18 = vadd.f32 %v204_v13, %v203_v11  ;;  %v197_v23 = vadd.f32 %v196_v12, %v193_v8  ;;  %v198_v24 = vmax.f32 %v193_v8, %v196_v12  ;;  %v217_v25 = vadd.f32 %v216_v21, %v215_v20  ;;  %v219_v26 = vld [vmem:[#allocation4 + $0x5] sm:$0x1]  ;;  %s415_s14 = sshll.u32 %s775_s13, 4  ;;  %v230_v33 = vld [vmem:[%s687_s4 + $0x6] sm:$0x1] }
  0x48   : > { %v227_v27 = vld [vmem:[%s687_s4 + $0x5] sm:$0x1]  ;;  %v187_v29 = vmul.f32 0.5, %v185_v16  ;;  %v220_v32 = vadd.f32 %v219_v26, %v218_v22  ;;  %v231_v34 = vld [vmem:[#allocation4 + $0x6] sm:$0x1]  ;;  %s717_s23 = scalar_lea.vmem %s758_s2, %s415_s14 }
  0x49   : > { %v228_v28 = vld [vmem:[#allocation4 + $0x5] sm:$0x1]  ;;  %v209_v30 = vadd.f32 %v208_v19, %v205_v18  ;;  %v210_v31 = vmax.f32 %v205_v18, %v208_v19  ;;  %v199_v35 = vmul.f32 0.5, %v197_v23  ;;  %v232_v37 = vadd.f32 %v231_v34, %v230_v33  ;;  %v239_v38 = vld [vmem:[%s687_s4 + $0x6] sm:$0x1] }
  0x4a   : > { %v229_v36 = vadd.f32 %v228_v28, %v227_v27  ;;  %v240_v39 = vld [vmem:[#allocation4 + $0x6] sm:$0x1]  ;;  %v188_v40 = vadd.f32 %v187_v29, %v186_v17  ;;  %v221_v42 = vadd.f32 %v220_v32, %v217_v25  ;;  %v222_v43 = vmax.f32 %v217_v25, %v220_v32  ;;  %v242_v44 = vld [vmem:[%s687_s4 + $0x7] sm:$0x1]  ;;  %v251_v50 = vld [vmem:[%s687_s4 + $0x8] sm:$0x1] }
  0x4b   : > { %v211_v41 = vmul.f32 0.5, %v209_v30  ;;  %v243_v45 = vld [vmem:[#allocation4 + $0x7] sm:$0x1]  ;;  %v200_v46 = vadd.f32 %v199_v35, %v198_v24  ;;  %v241_v49 = vadd.f32 %v240_v39, %v239_v38  ;;  %v252_v51 = vld [vmem:[#allocation4 + $0x8] sm:$0x1] }
  0x4c   : > { %v233_v47 = vadd.f32 %v232_v37, %v229_v36  ;;  %v234_v48 = vmax.f32 %v229_v36, %v232_v37  ;;  %v254_v52 = vld [vmem:[%s687_s4 + $0x9] sm:$0x1]  ;;  %v189_v53 = vmul.f32 0.5, %v188_v40  ;;  %v223_v55 = vmul.f32 0.5, %v221_v42  ;;  %v266_v0 = vld [vmem:[%s687_s4 + $0xa] sm:$0x1] }
  0x4d   : > { %v212_v54 = vadd.f32 %v211_v41, %v210_v31  ;;  %v244_v56 = vadd.f32 %v243_v45, %v242_v44  ;;  %v255_v57 = vld [vmem:[#allocation4 + $0x9] sm:$0x1]  ;;  %v201_v59 = vmul.f32 0.5, %v200_v46  ;;  %v253_v61 = vadd.f32 %v252_v51, %v251_v50  ;;  %v267_v5 = vld [vmem:[#allocation4 + $0xa] sm:$0x1] }
  0x4e   : > { %v263_v58 = vld [vmem:[%s687_s4 + $0x9] sm:$0x1]  ;;  %v235_v60 = vmul.f32 0.5, %v233_v47  ;;  %v256_v62 = vadd.f32 %v255_v57, %v254_v52  ;;  %190 = vst [vmem:[%s717_s23] sm:$0x1] %v189_v53  ;;  %v224_v2 = vadd.f32 %v223_v55, %v222_v43  ;;  %v275_v6 = vld [vmem:[%s687_s4 + $0xa] sm:$0x1]  ;;  %v268_v16 = vadd.f32 %v267_v5, %v266_v0 }
  0x4f   : > { %v264_v63 = vld [vmem:[#allocation4 + $0x9] sm:$0x1]  ;;  %v213_v1 = vmul.f32 0.5, %v212_v54  ;;  %v245_v3 = vadd.f32 %v244_v56, %v241_v49  ;;  %v246_v4 = vmax.f32 %v241_v49, %v244_v56  ;;  %202 = vst [vmem:[%s717_s23 + $0x1] sm:$0x1] %v201_v59 }
  0x50   : > { %v236_v7 = vadd.f32 %v235_v60, %v234_v48  ;;  %v257_v8 = vadd.f32 %v256_v62, %v253_v61  ;;  %v258_v9 = vmax.f32 %v253_v61, %v256_v62  ;;  %v265_v10 = vadd.f32 %v264_v63, %v263_v58  ;;  %v276_v11 = vld [vmem:[#allocation4 + $0xa] sm:$0x1]  ;;  %v278_v12 = vld [vmem:[%s687_s4 + $0xb] sm:$0x1]  ;;  %v287_v18 = vld [vmem:[%s687_s4 + $0xc] sm:$0x1] }
  0x51   : > { %v279_v13 = vld [vmem:[#allocation4 + $0xb] sm:$0x1]  ;;  %214 = vst [vmem:[%s717_s23 + $0x2] sm:$0x1] %v213_v1  ;;  %v225_v14 = vmul.f32 0.5, %v224_v2  ;;  %v247_v15 = vmul.f32 0.5, %v245_v3  ;;  %v277_v17 = vadd.f32 %v276_v11, %v275_v6 }
  0x52   : > { %v288_v19 = vld [vmem:[#allocation4 + $0xc] sm:$0x1]  ;;  %v237_v20 = vmul.f32 0.5, %v236_v7  ;;  %v259_v21 = vmul.f32 0.5, %v257_v8  ;;  %v280_v22 = vadd.f32 %v279_v13, %v278_v12  ;;  %v290_v24 = vld [vmem:[%s687_s4 + $0xd] sm:$0x1]  ;;  %v269_v27 = vadd.f32 %v268_v16, %v265_v10 }
  0x53   : > { %v289_v23 = vadd.f32 %v288_v19, %v287_v18  ;;  %v291_v25 = vld [vmem:[#allocation4 + $0xd] sm:$0x1]  ;;  %226 = vst [vmem:[%s717_s23 + $0x3] sm:$0x1] %v225_v14  ;;  %v248_v26 = vadd.f32 %v247_v15, %v246_v4  ;;  %v270_v28 = vmax.f32 %v265_v10, %v268_v16  ;;  %v302_v32 = vld [vmem:[%s687_s4 + $0xe] sm:$0x1] }
  0x54   : > { %v292_v29 = vadd.f32 %v291_v25, %v290_v24  ;;  %v299_v30 = vld [vmem:[%s687_s4 + $0xd] sm:$0x1]  ;;  %238 = vst [vmem:[%s717_s23 + $0x4] sm:$0x1] %v237_v20  ;;  %v260_v33 = vadd.f32 %v259_v21, %v258_v9  ;;  %v281_v34 = vadd.f32 %v280_v22, %v277_v17  ;;  %v282_v35 = vmax.f32 %v277_v17, %v280_v22  ;;  %v303_v37 = vld [vmem:[#allocation4 + $0xe] sm:$0x1] }
  0x55   : > { %v300_v31 = vld [vmem:[#allocation4 + $0xd] sm:$0x1]  ;;  %v311_v38 = vld [vmem:[%s687_s4 + $0xe] sm:$0x1]  ;;  %v249_v40 = vmul.f32 0.5, %v248_v26  ;;  %v271_v41 = vmul.f32 0.5, %v269_v27  ;;  %v304_v48 = vadd.f32 %v303_v37, %v302_v32 }
  0x56   : > { %v301_v36 = vadd.f32 %v300_v31, %v299_v30  ;;  %v312_v39 = vld [vmem:[#allocation4 + $0xe] sm:$0x1]  ;;  %v293_v42 = vadd.f32 %v292_v29, %v289_v23  ;;  %v294_v43 = vmax.f32 %v289_v23, %v292_v29  ;;  %v314_v44 = vld [vmem:[%s687_s4 + $0xf] sm:$0x1]  ;;  %v261_v46 = vmul.f32 0.5, %v260_v33 }
  0x57   : > { %v315_v45 = vld [vmem:[#allocation4 + $0xf] sm:$0x1]  ;;  %v283_v47 = vmul.f32 0.5, %v281_v34  ;;  %v313_v49 = vadd.f32 %v312_v39, %v311_v38  ;;  %250 = vst [vmem:[%s717_s23 + $0x5] sm:$0x1] %v249_v40  ;;  %v272_v50 = vadd.f32 %v271_v41, %v270_v28 }
  0x58   : > { %v295_v51 = vmul.f32 0.5, %v293_v42  ;;  %v316_v52 = vadd.f32 %v315_v45, %v314_v44  ;;  %262 = vst [vmem:[%s717_s23 + $0x6] sm:$0x1] %v261_v46  ;;  %v305_v54 = vadd.f32 %v304_v48, %v301_v36  ;;  %v306_v55 = vmax.f32 %v301_v36, %v304_v48 }
  0x59   : > { %v284_v53 = vadd.f32 %v283_v47, %v282_v35  ;;  %v273_v56 = vmul.f32 0.5, %v272_v50 }
  0x5a   : > { %v296_v57 = vadd.f32 %v295_v51, %v294_v43  ;;  %v317_v58 = vadd.f32 %v316_v52, %v313_v49  ;;  %v318_v59 = vmax.f32 %v313_v49, %v316_v52  ;;  %v307_v61 = vmul.f32 0.5, %v305_v54 }
  0x5b   : > { %v285_v60 = vmul.f32 0.5, %v284_v53  ;;  %274 = vst [vmem:[%s717_s23 + $0x7] sm:$0x1] %v273_v56 }
  0x5c   : > { %v297_v62 = vmul.f32 0.5, %v296_v57  ;;  %v319_v63 = vmul.f32 0.5, %v317_v58  ;;  %v308_v0 = vadd.f32 %v307_v61, %v306_v55 }
  0x5d   : > { %286 = vst [vmem:[%s717_s23 + $0x8] sm:$0x1] %v285_v60 }
  0x5e   : > { %298 = vst [vmem:[%s717_s23 + $0x9] sm:$0x1] %v297_v62  ;;  %v320_v1 = vadd.f32 %v319_v63, %v318_v59  ;;  %v309_v2 = vmul.f32 0.5, %v308_v0 }
  0x60   : > { %v321_v3 = vmul.f32 0.5, %v320_v1  ;;  %310 = vst [vmem:[%s717_s23 + $0xa] sm:$0x1] %v309_v2 }
  0x62   : > { %322 = vst [vmem:[%s717_s23 + $0xb] sm:$0x1] %v321_v3 }
  0x63 PF: > { %p13_p0 = scmp.ge.s32.totalorder %s625_s19, 4   ;;  %s770_s9 = smov %s552_s10 }
  0x64   : > { %s771_s10 = smov %s556_s11  ;;  %s772_s11 = smov %s645_s27 }
  0x65   : > { %s773_s12 = smov %s625_s19  ;;  %15 = sbr.rel (!%p13_p0) target bundleno = 4 (0x4), region = 72 }
  0x6a   :  { %344 = vsyncpa [#allocation3], 1 }
  0x6b   :  { %346 = vsyncpa [#allocation3 + $0x1], 1 }
  0x6c   :  { %347 = vsyncpa [#allocation5], 1 }

</bundles_post_ra>
